<compile_context>
chip_gen: v5e
topology: v5e:2x2
jax: 0.10.0
libtpu: 0.0.40
codegen_flags: <defaults>
</compile_context>

<pallas_src>
import jax
import jax.numpy as jnp
from jax.experimental import pallas as pl
from jax.experimental.pallas import tpu as pltpu

EPS = 1e-5
LANES = 128


def _lda_kernel(x_ref, gb_ref, wt_ref, b_ref, o_ref):
    # Single grid step: every ref is the full (small) array resident in VMEM.
    x = x_ref[...]                       # [B, D]   float32
    gb = gb_ref[...]                     # [2, D]   float32 (row0=gamma, row1=beta)
    gamma = gb[0:1, :]                   # [1, D]
    beta = gb[1:2, :]                    # [1, D]

    inv_b = jnp.float32(1.0 / x.shape[0])

    # --- BatchNorm1d batch statistics (training mode, biased variance), f32 --
    mean = jnp.sum(x, axis=0, keepdims=True) * inv_b                   # [1, D]
    centered = x - mean
    var = jnp.sum(centered * centered, axis=0, keepdims=True) * inv_b  # [1, D]
    inv_std = jax.lax.rsqrt(var + EPS)                                 # EUP

    # --- Fold scale AND shift into the activations (1 vreg of VPU work) -----
    x_hat = centered * (inv_std * gamma) + beta                        # [B, D]

    # --- Single MXU push: bf16 operands, f32 accumulation, [B,D]@[D,Cp] -----
    y = jnp.dot(x_hat.astype(jnp.bfloat16), wt_ref[...],
                preferred_element_type=jnp.float32)                    # [B, Cp]

    # Lane-dense store: Cp is a multiple of 128 -> unmasked full-lane vst.
    o_ref[...] = y + b_ref[...]


def prepare_params(weight, bias, gamma, beta):
    """One-time parameter prep, hoisted out of the per-call hot path.

    weight: [C, D] (PyTorch nn.Linear layout), bias: [C], gamma/beta: [D].
    Returns:
      gb      [2, D]  float32   (packed gamma/beta -> one input, one DMA)
      wt      [D, Cp] bfloat16  (pre-transposed, pre-cast, zero-padded classes)
      b_pad   [1, Cp] float32
    """
    c, d = weight.shape
    c_pad = ((c + LANES - 1) // LANES) * LANES
    w_pad = jnp.pad(weight.astype(jnp.float32), ((0, c_pad - c), (0, 0)))
    wt = jnp.asarray(w_pad.T, dtype=jnp.bfloat16)                       # [D, Cp]
    b_pad = jnp.pad(bias.astype(jnp.float32), (0, c_pad - c)).reshape(1, c_pad)
    gb = jnp.stack([gamma, beta]).astype(jnp.float32)                   # [2, D]
    return gb, wt, b_pad


@jax.jit
def lda_forward(x, gb, wt, b_pad):
    """x: [B, D] f32; gb: [2, D] f32; wt: [D, Cp] bf16; b_pad: [1, Cp] f32.

    Returns the padded [B, Cp] float32 result; valid logits are columns [:C]
    (padded columns are exactly zero). No slice is done here on purpose --
    the consumer reads the first C lanes (review item: avoid a standalone
    slice HLO + extra HBM round trip in the hot path).
    """
    B, D = x.shape
    Cp = wt.shape[1]

    full = lambda shape: pl.BlockSpec(shape, lambda: tuple(0 for _ in shape))

    return pl.pallas_call(
        _lda_kernel,
        out_shape=jax.ShapeDtypeStruct((B, Cp), jnp.float32),
        grid_spec=pltpu.PrefetchScalarGridSpec(
            num_scalar_prefetch=0,
            grid=(),
            in_specs=[
                full((B, D)),     # x
                full((2, D)),     # packed gamma/beta
                full((D, Cp)),    # pre-transposed bf16 weight
                full((1, Cp)),    # padded bias
            ],
            out_specs=full((B, Cp)),
        ),
    )(x, gb, wt, b_pad)


def lda_reference(x, gamma, beta, weight, bias):
    mean = jnp.mean(x, axis=0, keepdims=True)
    var = jnp.mean((x - mean) ** 2, axis=0, keepdims=True)
    x_hat = (x - mean) / jnp.sqrt(var + EPS) * gamma + beta
    return x_hat @ weight.T + bias


if __name__ == "__main__":
    B, D, C = 8, 32, 4  # batch, input_dim, num_classes

    key = jax.random.PRNGKey(0)
    kx, kw, kb = jax.random.split(key, 3)

    x = jax.random.normal(kx, (B, D), dtype=jnp.float32)

    # Deterministic parameter init (mimics PyTorch defaults):
    # Linear: uniform(-1/sqrt(D), 1/sqrt(D)); BatchNorm: gamma=1, beta=0.
    bound = 1.0 / jnp.sqrt(jnp.float32(D))
    weight = jax.random.uniform(kw, (C, D), minval=-bound, maxval=bound,
                                dtype=jnp.float32)
    bias = jax.random.uniform(kb, (C,), minval=-bound, maxval=bound,
                              dtype=jnp.float32)
    gamma = jnp.ones((D,), dtype=jnp.float32)
    beta = jnp.zeros((D,), dtype=jnp.float32)

    # One-time prep (pad + transpose + cast + pack), outside the hot path.
    gb, wt, b_pad = prepare_params(weight, bias, gamma, beta)

    out_pad = lda_forward(x, gb, wt, b_pad)         # [B, Cp]
    out_pad = jax.block_until_ready(out_pad)

    # Consumer-side read of the first C columns (outside the kernel hot path).
    out = out_pad[:, :C]

    ref = lda_reference(x, gamma, beta, weight, bias)
    assert out.shape == (B, C)
    # bf16 MXU operands with f32 accumulation over D=32 -> ~1e-3 abs error.
    assert jnp.allclose(out, ref, atol=2e-2, rtol=2e-2), "mismatch vs reference"
    # Padded class columns must be exactly zero (zero-padded weight & bias).
    assert jnp.all(out_pad[:, C:] == 0.0), "padded columns not zero"

    print("KERNEL_OK")
</pallas_src>

<mosaic_0001>
module attributes {stable_mosaic.version = 11 : i64} {
  func.func @_lda_kernel(%arg0: memref<8x32xf32, #tpu.memory_space<vmem>>, %arg1: memref<2x32xf32, #tpu.memory_space<vmem>>, %arg2: memref<32x128xbf16, #tpu.memory_space<vmem>>, %arg3: memref<1x128xf32, #tpu.memory_space<vmem>>, %arg4: memref<8x128xf32, #tpu.memory_space<vmem>>) attributes {dimension_semantics = [], scalar_prefetch = 0 : i64, scratch_operands = 0 : i64, tpu.core_type = #tpu.core_type<tc>} {
    %c0 = arith.constant 0 : index
    %c0_0 = arith.constant 0 : index
    %0 = vector.load %arg0[%c0, %c0_0] : memref<8x32xf32, #tpu.memory_space<vmem>>, vector<8x32xf32>
    %c0_1 = arith.constant 0 : index
    %c0_2 = arith.constant 0 : index
    %1 = vector.load %arg1[%c0_1, %c0_2] : memref<2x32xf32, #tpu.memory_space<vmem>>, vector<2x32xf32>
    %2 = vector.extract_strided_slice %1 {offsets = [0, 0], sizes = [1, 32], strides = [1, 1]} : vector<2x32xf32> to vector<1x32xf32>
    %3 = vector.extract_strided_slice %1 {offsets = [1, 0], sizes = [1, 32], strides = [1, 1]} : vector<2x32xf32> to vector<1x32xf32>
    %cst = arith.constant dense<0.000000e+00> : vector<32xf32>
    %4 = vector.multi_reduction <add>, %0, %cst [0] : vector<8x32xf32> to vector<32xf32>
    %5 = vector.shape_cast %4 : vector<32xf32> to vector<1x32xf32>
    %cst_3 = arith.constant 1.250000e-01 : f32
    %6 = vector.broadcast %cst_3 : f32 to vector<1x32xf32>
    %7 = arith.mulf %5, %6 : vector<1x32xf32>
    %8 = vector.broadcast %7 : vector<1x32xf32> to vector<8x32xf32>
    %9 = arith.subf %0, %8 : vector<8x32xf32>
    %10 = arith.mulf %9, %9 : vector<8x32xf32>
    %cst_4 = arith.constant dense<0.000000e+00> : vector<32xf32>
    %11 = vector.multi_reduction <add>, %10, %cst_4 [0] : vector<8x32xf32> to vector<32xf32>
    %12 = vector.shape_cast %11 : vector<32xf32> to vector<1x32xf32>
    %cst_5 = arith.constant 1.250000e-01 : f32
    %13 = vector.broadcast %cst_5 : f32 to vector<1x32xf32>
    %14 = arith.mulf %12, %13 : vector<1x32xf32>
    %cst_6 = arith.constant 9.99999974E-6 : f32
    %15 = vector.broadcast %cst_6 : f32 to vector<1x32xf32>
    %16 = arith.addf %14, %15 : vector<1x32xf32>
    %17 = math.rsqrt %16 : vector<1x32xf32>
    %18 = arith.mulf %17, %2 : vector<1x32xf32>
    %19 = vector.broadcast %18 : vector<1x32xf32> to vector<8x32xf32>
    %20 = arith.mulf %9, %19 : vector<8x32xf32>
    %21 = vector.broadcast %3 : vector<1x32xf32> to vector<8x32xf32>
    %22 = arith.addf %20, %21 : vector<8x32xf32>
    %23 = arith.truncf %22 : vector<8x32xf32> to vector<8x32xbf16>
    %c0_7 = arith.constant 0 : index
    %c0_8 = arith.constant 0 : index
    %24 = vector.load %arg2[%c0_7, %c0_8] : memref<32x128xbf16, #tpu.memory_space<vmem>>, vector<32x128xbf16>
    %cst_9 = arith.constant dense<0.000000e+00> : vector<8x128xf32>
    %25 = tpu.matmul %23, %24, %cst_9 {dimension_numbers = #tpu.dot_dimension_numbers<[1], [0], [0], [1], [0, 0, 1, 1], [], []>} : vector<8x32xbf16>, vector<32x128xbf16>, vector<8x128xf32> -> vector<8x128xf32>
    %c0_10 = arith.constant 0 : index
    %c0_11 = arith.constant 0 : index
    %26 = vector.load %arg3[%c0_10, %c0_11] : memref<1x128xf32, #tpu.memory_space<vmem>>, vector<1x128xf32>
    %27 = vector.broadcast %26 : vector<1x128xf32> to vector<8x128xf32>
    %28 = arith.addf %25, %27 : vector<8x128xf32>
    %c0_12 = arith.constant 0 : index
    %c0_13 = arith.constant 0 : index
    %29 = vector.load %arg4[%c0_12, %c0_13] : memref<8x128xf32, #tpu.memory_space<vmem>>, vector<8x128xf32>
    tpu.vector_store %arg4[%c0_12, %c0_13], %28 {strides = array<i32>} : memref<8x128xf32, #tpu.memory_space<vmem>>, vector<8x128xf32>,
    return
  }
}

</mosaic_0001>

<bundles_post_ra>
// kernel: lda_forward.1
= control target key start
LH: loop header
LB: loop body
LE: loop exit
PB: predicated region body
PF: predicated region fallthrough
CT: control target
= control target key end

     0   :  { %9 = vsyncpa [#allocation3], 0  ;;  %s326_s0 = inlined_call_operand.hbm [shape: f32[8,32], index: 0, kind: input, shape index: {}]   ;;  %s327_s1 = inlined_call_operand.hbm [shape: f32[2,32], index: 1, kind: input, shape index: {}]   ;;  %s328_s2 = inlined_call_operand.hbm [shape: bf16[32,128], index: 2, kind: input, shape index: {}]   ;;  %s329_s3 = inlined_call_operand.vmem [shape: f32[1,128], index: 3, kind: input, shape index: {}]   ;;  %s330_s4 = inlined_call_operand.hbm [shape: f32[8,128], index: 4, kind: output, shape index: {}]  }
   0x1   :  { %10 = vsyncpa [#allocation6], 0  ;;  %s28_s17 = sshll.u32 %s327_s1, 4  ;;  %s29_s17 = int_to_ptr.hbm [resolvable:$true] %s28_s17 }
   0x2   :  { %11 = vsyncpa [#allocation4], 0  ;;  %s277_s18 = smov [#allocation5]   ;;  %s17_s22 = sshll.u32 %s326_s0, 4  ;;  %s18_s22 = int_to_ptr.hbm [resolvable:$true] %s17_s22 }
   0x3   :  { %s30_s19 = sshll.u32 %s277_s18, 4  ;;  %s278_s23 = smov [#allocation2]   ;;  %s31_s19 = int_to_ptr.vmem [resolvable:$true] %s30_s19 }
   0x4   :  { %33 = dma.hbm_to_vmem [thread:$0]  %s29_s17, 32, %s31_s19, [#allocation6]  }
   0x5   :  { %s19_s24 = sshll.u32 %s278_s23, 4  ;;  %s38_s27 = sshll.u32 %s328_s2, 4  ;;  %s20_s24 = int_to_ptr.vmem [resolvable:$true] %s19_s24  ;;  %s39_s27 = int_to_ptr.hbm [resolvable:$true] %s38_s27 }
   0x6   :  { %22 = dma.hbm_to_vmem [thread:$0]  %s18_s22, 128, %s20_s24, [#allocation3]  }
   0x7   :  { %s279_s1 = smov [#allocation7]   ;;  %s280_s29 = smov 64  }
   0x8   :  { %s40_s28 = sshll.u32 %s279_s1, 4  ;;  %s281_s30 = smov 4   ;;  %s41_s28 = int_to_ptr.vmem [resolvable:$true] %s40_s28 }
   0x9   :  { %46 = dma.hbm_to_vmem [thread:$0]  %s39_s27, 256, %s41_s28, [#allocation6], %s280_s29, %s280_s29, %s281_s30  }
   0xa   :  { %271 = dma.done.wait [#allocation3], 128  }
   0xb   :  { %272 = vsyncadd [#allocation3], 4294967168 }
   0xc   :  { %273 = dma.done.wait [#allocation6], 288  }
   0xd   :  { %274 = vsyncadd [#allocation6], 4294967008  ;;  %vm64_vm0 = vcmask 261120   ;;  %v165_v0 = vld [vmem:[#allocation7 + $0x8] sm:$0xff]  ;;  %v62_v1 = vld [vmem:[#allocation2] sm:$0xff]  ;;  %s282_s5 = smov [#allocation8]  }
   0xe   :  { %v65_v2 = vsel %vm64_vm0, %v62_v1, 0.0  ;;  %129 = vmatpush.bf16.msra.mxu0 %v165_v0  ;;  %v164_v3 = vld [vmem:[#allocation7] sm:$0xff]  ;;  %v63_v27 = vld [vmem:[#allocation5] sm:$0x3]  ;;  %v172_v36 = vld [vmem:[%s329_s3] ss:$0 sm:$0xff] }
   0xf   :  { %v66_v4 = vrot.slane %v65_v2, 4  ;;  %v97_v32 = vperm.slane %v63_v27, 1  ;;  %s142_s6 = sshll.u32 %s282_s5, 4  ;;  %s144_s9 = sshll.u32 %s330_s4, 4  ;;  %s143_s6 = int_to_ptr.vmem [resolvable:$true] %s142_s6  ;;  %s145_s9 = int_to_ptr.hbm [resolvable:$true] %s144_s9 }
  0x11   :  { %v67_v5 = vadd.f32 %v66_v4, %v65_v2 }
  0x12   :  { %130 = vmatpush.bf16.msra.mxu0 %v164_v3 }
  0x13   :  { %v68_v6 = vrot.slane %v67_v5, 2 }
  0x15   :  { %v69_v7 = vadd.f32 %v68_v6, %v67_v5 }
  0x17   :  { %v70_v8 = vrot.slane %v69_v7, 1 }
  0x19   :  { %v71_v9 = vadd.f32 %v70_v8, %v69_v7 }
  0x1b   :  { %v72_v10 = vmul.f32 0.125, %v71_v9 }
  0x1d   :  { %v73_v11 = vsub.f32 %v62_v1, %v72_v10 }
  0x1f   :  { %v74_v12 = vmul.f32 %v73_v11, %v73_v11 }
  0x21   :  { %v75_v13 = vsel %vm64_vm0, %v74_v12, 0.0 }
  0x22   :  { %v76_v14 = vrot.slane %v75_v13, 4 }
  0x24   :  { %v77_v15 = vadd.f32 %v76_v14, %v75_v13 }
  0x26   :  { %v78_v16 = vrot.slane %v77_v15, 2 }
  0x28   :  { %v79_v17 = vadd.f32 %v78_v16, %v77_v15 }
  0x2a   :  { %v80_v18 = vrot.slane %v79_v17, 1 }
  0x2c   :  { %v81_v19 = vadd.f32 %v80_v18, %v79_v17 }
  0x2e   :  { %v82_v20 = vmul.f32 0.125, %v81_v19 }
  0x30   :  { %v83_v21 = vadd.f32 1e-05, %v82_v20 }
  0x32   :  { %173 = vrsqrt.f32 %v83_v21  ;;  %vm90_vm1 = vweird.f32 %v83_v21 }
  0x38   :  { %v174_v22 = vpop.eup %173 }
  0x39   :  { %v85_v23 = vmul.f32 %v174_v22, %v83_v21  ;;  %vm91_vm2 = vweird.f32 %v174_v22 }
  0x3a   :  { %vm92_vm3 = vmor %vm90_vm1, %vm91_vm2 }
  0x3b   :  { %v86_v24 = vmul.f32 %v174_v22, %v85_v23 }
  0x3d   :  { %v87_v25 = vmul.f32 0.5, %v86_v24 }
  0x3f   :  { %v88_v26 = vsub.f32 1.5, %v87_v25 }
  0x41   :  { %v89_v28 = vmul.f32 %v174_v22, %v88_v26 }
  0x43   :  { %v93_v29 = vsel %vm92_vm3, %v174_v22, %v89_v28 }
  0x44   :  { %v94_v30 = vmul.f32 %v93_v29, %v63_v27 }
  0x46   :  { %v95_v31 = vperm.slane %v94_v30, 0 }
  0x48   :  { %v96_v33 = vmul.f32 %v95_v31, %v73_v11 }
  0x4a   :  { %v98_v34 = vadd.f32 %v97_v32, %v96_v33 }
  0x4c   :  { %v99_v35 = vpack.c.bf16 %v98_v34, %v98_v34 }
  0x4e   :  { %163 = vmatmul.msk.bf16.vlgmr.msra.gmra.mxu0 %vm64_vm0, %v99_v35 }
  0xcb   :  { %v132_v37 = vpop.f32.mrf.mxu0 }
  0xcc   :  { %v133_v38 = vadd.f32 %v172_v36, %v132_v37 }
  0xce   :  { %136 = vst [vmem:[#allocation8] sm:$0xff] %v133_v38 }
  0xcf   :  { %147 = dma.vmem_to_hbm [thread:$0]  %s143_s6, 128, %s145_s9, [#allocation4]  }
  0xd3   :  { %v134_v39 = vpop.f32.mrf.mxu0 }
  0xd4   :  { %275 = dma.done.wait [#allocation4], 128  }
  0xd5   :  { %276 = vsyncadd [#allocation4], 4294967168 }
  0xd6   :  { %152 = vsyncpa [#allocation3], 1 }
  0xd7   :  { %153 = vsyncpa [#allocation6], 1 }
  0xd8   :  { %154 = vsyncpa [#allocation4], 1 }

</bundles_post_ra>
